<compile_context>
chip_gen: v7x
topology: tpu7x:2x2x1
jax: 0.10.0
libtpu: 0.0.40
codegen_flags: <defaults>
</compile_context>

<pallas_src>
import functools

import jax
import jax.numpy as jnp
from jax.experimental import pallas as pl
from jax.experimental.pallas import tpu as pltpu

LANE = 128
SUBLANE16 = 16  # bf16 sublane packing


def _round_up(v, k):
    return (v + k - 1) // k * k


def _choose_batch_tile(b):
    """Pick (Bp, tb): tb multiple of 16, low padding, prefer >=2 grid steps."""
    b16 = _round_up(b, SUBLANE16)
    best = None
    for tb in range(SUBLANE16, min(512, b16) + 1, SUBLANE16):
        bp = _round_up(b16, tb)
        steps = bp // tb
        # cost: padded rows (wasted MXU/EUP work) + per-step overhead
        #       + penalty for a 1-step grid (idles v7x's second TensorCore)
        cost = bp + 4 * steps + (b16 if steps == 1 else 0)
        if best is None or cost < best[0]:
            best = (cost, tb, bp)
    _, tb, bp = best
    return bp, tb


def _supports_bf16_eup():
    """bf16 VPU/EUP exists on v6e/v7x; not on v5e and older."""
    try:
        kind = jax.devices()[0].device_kind.lower()
    except Exception:
        return False
    if "tpu" not in kind:
        return False
    for old in ("v2", "v3", "v4", "v5"):
        if old in kind:
            return False
    return True


def _vmem_limit_bytes(tb, Fp, Hp, Np, weight_buffers):
    """Compute the VMEM budget from actual buffer sizes (plus headroom)."""
    weight_bytes = (2 * Fp * Hp) * 2          # w1x + w2, bf16
    weight_bytes += Np * Np * 4               # A, f32
    weight_bytes += (2 * Hp + Fp) * 4         # w1t, b1, b2, f32
    act_bytes = (tb * 1 * 4 + tb * Fp * 4 + tb * Fp * 4) * 2   # t/x/dx, dbl-buf
    needed = weight_bytes * weight_buffers + act_bytes
    try:
        phys = pltpu.get_tpu_info().vmem_capacity_bytes
    except Exception:
        phys = 64 * 1024 * 1024               # v7x per-TC VMEM (smallest gen)
    return int(min(phys - 2 * 1024 * 1024,
                   max(2 * needed, 16 * 1024 * 1024)))


def nnc_dynamics_kernel(t_ref, x_ref, w1t_ref, w1x_ref, b1_ref, w2_ref,
                        b2_ref, a_ref, dx_ref, *, num_state_vars, node_lanes,
                        bf16_tanh):
    """Fused NNC forward for one batch tile.

    t_ref  : [TB, 1]    time (f32)
    x_ref  : [TB, Fp]   flattened padded state (f32), Fp = m * Np
    w1t_ref: [1, Hp]    time row of first MLP layer (f32)
    w1x_ref: [Fp, Hp]   state rows of first MLP layer (bf16)
    b1_ref : [1, Hp]    (f32)
    w2_ref : [Hp, Fp]   second MLP layer (bf16)
    b2_ref : [1, Fp]    (f32)
    a_ref  : [Np, Np]   node-coupling matrix (f32, full precision)
    dx_ref : [TB, Fp]   output derivative (f32)
    """
    t = t_ref[...]                                      # [TB, 1]  f32
    x = x_ref[...]                                      # [TB, Fp] f32
    x_lp = x.astype(w1x_ref.dtype)                      # bf16 MXU operand

    # --- controller MLP:  u = tanh(tanh([t, x] @ W1 + b1) @ W2 + b2) ---
    # Time column of W1 is a rank-1 update: broadcast on the VPU instead of a
    # K=1 MXU matmul.
    z1 = t * w1t_ref[...]                               # [TB, Hp] (VPU)
    z1 = z1 + jnp.dot(x_lp, w1x_ref[...],
                      preferred_element_type=jnp.float32)
    z1 = z1 + b1_ref[...]
    if bf16_tanh:                                       # bf16 EUP (v6e/v7x)
        h = jnp.tanh(z1.astype(jnp.bfloat16))
    else:                                               # f32 EUP (v5e)
        h = jnp.tanh(z1)

    z2 = jnp.dot(h.astype(w2_ref.dtype), w2_ref[...],
                 preferred_element_type=jnp.float32) + b2_ref[...]
    if bf16_tanh:
        u = jnp.tanh(z2.astype(jnp.bfloat16)).astype(jnp.float32)
    else:
        u = jnp.tanh(z2)                                # [TB, Fp] f32

    # --- underlying controlled dynamics:  dx[:, mi] = x[:, mi] @ A + u[:, mi]
    # Per-state-variable lane-aligned chunks; A stays [Np, Np] (no kron lift)
    # and is kept f32 so the physical coupling term keeps full precision.
    # Static loop (small m); Mosaic reuses/hoists the same MXU RHS.
    a = a_ref[...]
    for mi in range(num_state_vars):
        lo = mi * node_lanes
        hi = lo + node_lanes
        dxc = jnp.dot(x[:, lo:hi], a,
                      preferred_element_type=jnp.float32) + u[:, lo:hi]
        dx_ref[:, lo:hi] = dxc.astype(dx_ref.dtype)


def _build_nnc_call(Bp, tb, Fp, Hp, Np, m, bf16_tanh, single_buffer_weights):
    kernel = functools.partial(nnc_dynamics_kernel, num_state_vars=m,
                               node_lanes=Np, bf16_tanh=bf16_tanh)

    if single_buffer_weights:
        def wspec(shape):
            # constant index_map -> a single VMEM buffer is enough
            return pl.BlockSpec(shape, lambda i: (0, 0),
                                pipeline_mode=pl.Buffered(1))
    else:
        def wspec(shape):
            return pl.BlockSpec(shape, lambda i: (0, 0))

    weight_bytes = (2 * Fp * Hp) * 2 + Np * Np * 4 + (2 * Hp + Fp) * 4
    cost = pl.CostEstimate(
        flops=2 * Bp * (2 * Fp * Hp + Fp * Np),
        transcendentals=Bp * (Hp + Fp),
        bytes_accessed=Bp * (1 + 2 * Fp) * 4 + weight_bytes,
    )

    return pl.pallas_call(
        kernel,
        out_shape=jax.ShapeDtypeStruct((Bp, Fp), jnp.float32),
        grid=(Bp // tb,),
        in_specs=[
            pl.BlockSpec((tb, 1), lambda i: (i, 0)),     # t
            pl.BlockSpec((tb, Fp), lambda i: (i, 0)),    # x
            wspec((1, Hp)),                              # w1_t
            wspec((Fp, Hp)),                             # w1_x
            wspec((1, Hp)),                              # b1
            wspec((Hp, Fp)),                             # w2
            wspec((1, Fp)),                              # b2
            wspec((Np, Np)),                             # A
        ],
        out_specs=pl.BlockSpec((tb, Fp), lambda i: (i, 0)),
        compiler_params=pltpu.CompilerParams(
            dimension_semantics=("parallel",),           # megacore batch split
            vmem_limit_bytes=_vmem_limit_bytes(
                tb, Fp, Hp, Np, 1 if single_buffer_weights else 2),
        ),
        cost_estimate=cost,
    )


def prepare_nnc_params(params, m, n, compute_dtype=jnp.bfloat16):
    """Pad / split / cast parameters once (hoisted out of the per-step path)."""
    w1, b1, w2, b2, A = params
    H = w1.shape[1]
    Np = _round_up(n, LANE)
    Hp = _round_up(H, LANE)
    Fp = m * Np

    w1t_p = jnp.zeros((1, Hp), jnp.float32).at[:, :H].set(
        w1[0:1, :].astype(jnp.float32))
    w1x = w1[1:, :].reshape(m, n, H).astype(jnp.float32)
    w1x_p = (jnp.zeros((m, Np, Hp), jnp.float32)
             .at[:, :n, :H].set(w1x)
             .reshape(Fp, Hp).astype(compute_dtype))
    b1_p = jnp.zeros((1, Hp), jnp.float32).at[:, :H].set(
        b1.reshape(1, H).astype(jnp.float32))
    w2_p = (jnp.zeros((Hp, m, Np), jnp.float32)
            .at[:H, :, :n].set(w2.reshape(H, m, n).astype(jnp.float32))
            .reshape(Hp, Fp).astype(compute_dtype))
    b2_p = (jnp.zeros((1, m, Np), jnp.float32)
            .at[:, :, :n].set(b2.reshape(1, m, n).astype(jnp.float32))
            .reshape(1, Fp))
    # A stays f32: the physical coupling x @ A keeps full precision so error
    # does not compound across ODE integration steps.
    a_p = jnp.zeros((Np, Np), jnp.float32).at[:n, :n].set(
        A.astype(jnp.float32))

    return {"w1t": w1t_p, "w1x": w1x_p, "b1": b1_p, "w2": w2_p, "b2": b2_p,
            "A": a_p, "m": m, "n": n, "H": H, "Np": Np, "Hp": Hp, "Fp": Fp}


def nnc_dynamics_forward(t, x, prepared):
    """t: [b, 1] (or [1]) f32, x: [b, m, n] f32 -> dx: [b, m, n] f32."""
    b, m, n = x.shape
    assert m == prepared["m"] and n == prepared["n"]
    Np, Hp, Fp = prepared["Np"], prepared["Hp"], prepared["Fp"]

    Bp, tb = _choose_batch_tile(b)

    # time: accept [b,1] or [1] (shared across batch)
    t = jnp.broadcast_to(jnp.asarray(t, jnp.float32).reshape(-1, 1), (b, 1))
    t_p = t if b == Bp else jnp.zeros((Bp, 1), jnp.float32).at[:b].set(t)

    # state stays f32 (no wrapper bf16 cast pass); free reshape when n is
    # already lane-aligned.
    xf = x.astype(jnp.float32)
    if n == Np:
        x_flat = xf.reshape(b, Fp)
        x_p = (x_flat if b == Bp
               else jnp.zeros((Bp, Fp), jnp.float32).at[:b].set(x_flat))
    else:
        x_p = (jnp.zeros((Bp, m, Np), jnp.float32)
               .at[:b, :, :n].set(xf).reshape(Bp, Fp))

    bf16_tanh = _supports_bf16_eup()
    args = (t_p, x_p, prepared["w1t"], prepared["w1x"], prepared["b1"],
            prepared["w2"], prepared["b2"], prepared["A"])
    try:
        dx_p = _build_nnc_call(Bp, tb, Fp, Hp, Np, m, bf16_tanh,
                               single_buffer_weights=True)(*args)
    except Exception:
        # pl.Buffered(1) not supported on this JAX build -> default dbl buffer
        dx_p = _build_nnc_call(Bp, tb, Fp, Hp, Np, m, bf16_tanh,
                               single_buffer_weights=False)(*args)

    if n == Np and b == Bp:
        return dx_p.reshape(b, m, n)
    return dx_p.reshape(Bp, m, Np)[:b, :, :n]


def reference_forward(t, x, params):
    """Pure-JAX f32 reference of the same semantics."""
    b, m, n = x.shape
    w1, b1, w2, b2, A = params
    x_flat = x.reshape(b, m * n)
    inp = jnp.concatenate([jnp.broadcast_to(t.reshape(-1, 1), (b, 1)), x_flat],
                          axis=1)
    h = jnp.tanh(inp @ w1 + b1)
    u = jnp.tanh(h @ w2 + b2).reshape(b, m, n)
    dx = jnp.einsum("bmn,nk->bmk", x, A) + u
    return dx


def init_params(key, m, n_nodes, hidden):
    F = m * n_nodes
    k1, k2, k3, k4, k5 = jax.random.split(key, 5)
    w1 = jax.random.normal(k1, (1 + F, hidden), jnp.float32) * 0.1
    b1 = jax.random.normal(k2, (hidden,), jnp.float32) * 0.01
    w2 = jax.random.normal(k3, (hidden, F), jnp.float32) * 0.1
    b2 = jax.random.normal(k4, (F,), jnp.float32) * 0.01
    A = jax.random.normal(k5, (n_nodes, n_nodes), jnp.float32) * 0.1
    return (w1, b1, w2, b2, A)


def _run_case(key, b, m, n_nodes, hidden):
    kp, kt, kx = jax.random.split(key, 3)
    params = init_params(kp, m, n_nodes, hidden)
    prepared = prepare_nnc_params(params, m, n_nodes)   # once per integration
    t = jax.random.uniform(kt, (b, 1), jnp.float32)
    x = jax.random.normal(kx, (b, m, n_nodes), jnp.float32)

    dx = jax.block_until_ready(nnc_dynamics_forward(t, x, prepared))
    dx_ref = reference_forward(t, x, params)
    assert dx.shape == (b, m, n_nodes)
    # bf16 MXU operands (MLP) + possibly bf16 tanh -> loosened tolerance;
    # the x @ A coupling term itself is exact f32.
    assert jnp.allclose(dx, dx_ref, atol=3e-2, rtol=3e-2), (
        f"mismatch vs reference: max abs err "
        f"{float(jnp.max(jnp.abs(dx - dx_ref)))}")


if __name__ == "__main__":
    key = jax.random.PRNGKey(0)
    k1, k2 = jax.random.split(key)

    # Case 1: tiny shapes (single grid step, node padding 16 -> 128).
    _run_case(k1, b=2, m=2, n_nodes=16, hidden=32)

    # Case 2: multi-step batch grid (b=40 -> Bp=48, tb=16, grid=(3,)),
    # lane-aligned nodes (n=128 -> no node padding, free reshape path).
    _run_case(k2, b=40, m=2, n_nodes=128, hidden=64)

    print("KERNEL_OK")
</pallas_src>

<mosaic_0001>
module attributes {stable_mosaic.version = 11 : i64} {
  func.func @nnc_dynamics_kernel(%arg0: i32, %arg1: memref<16x1xf32, #tpu.memory_space<vmem>>, %arg2: memref<16x256xf32, #tpu.memory_space<vmem>>, %arg3: memref<1x128xf32, #tpu.memory_space<vmem>>, %arg4: memref<256x128xbf16, #tpu.memory_space<vmem>>, %arg5: memref<1x128xf32, #tpu.memory_space<vmem>>, %arg6: memref<128x256xbf16, #tpu.memory_space<vmem>>, %arg7: memref<1x256xf32, #tpu.memory_space<vmem>>, %arg8: memref<128x128xf32, #tpu.memory_space<vmem>>, %arg9: memref<16x256xf32, #tpu.memory_space<vmem>>) attributes {dimension_semantics = [#tpu.dimension_semantics<parallel>], iteration_bounds = array<i64: 1>, scalar_prefetch = 0 : i64, scratch_operands = 0 : i64, tpu.core_type = #tpu.core_type<tc>, window_params = [{transform_indices = @transform_0, window_bounds = array<i64: 16, 1>}, {transform_indices = @transform_1, window_bounds = array<i64: 16, 256>}, {pipeline_mode = #tpu.pipeline_mode<synchronous>, transform_indices = @transform_2, window_bounds = array<i64: 1, 128>}, {pipeline_mode = #tpu.pipeline_mode<synchronous>, transform_indices = @transform_3, window_bounds = array<i64: 256, 128>}, {pipeline_mode = #tpu.pipeline_mode<synchronous>, transform_indices = @transform_4, window_bounds = array<i64: 1, 128>}, {pipeline_mode = #tpu.pipeline_mode<synchronous>, transform_indices = @transform_5, window_bounds = array<i64: 128, 256>}, {pipeline_mode = #tpu.pipeline_mode<synchronous>, transform_indices = @transform_6, window_bounds = array<i64: 1, 256>}, {pipeline_mode = #tpu.pipeline_mode<synchronous>, transform_indices = @transform_7, window_bounds = array<i64: 128, 128>}, {transform_indices = @transform_8, window_bounds = array<i64: 16, 256>}]} {
    %c0 = arith.constant 0 : index
    %c0_0 = arith.constant 0 : index
    %0 = vector.load %arg1[%c0, %c0_0] : memref<16x1xf32, #tpu.memory_space<vmem>>, vector<16x1xf32>
    %c0_1 = arith.constant 0 : index
    %c0_2 = arith.constant 0 : index
    %1 = vector.load %arg2[%c0_1, %c0_2] : memref<16x256xf32, #tpu.memory_space<vmem>>, vector<16x256xf32>
    %2 = arith.truncf %1 : vector<16x256xf32> to vector<16x256xbf16>
    %c0_3 = arith.constant 0 : index
    %c0_4 = arith.constant 0 : index
    %3 = vector.load %arg3[%c0_3, %c0_4] : memref<1x128xf32, #tpu.memory_space<vmem>>, vector<1x128xf32>
    %4 = vector.broadcast %0 : vector<16x1xf32> to vector<16x128xf32>
    %5 = vector.broadcast %3 : vector<1x128xf32> to vector<16x128xf32>
    %6 = arith.mulf %4, %5 : vector<16x128xf32>
    %c0_5 = arith.constant 0 : index
    %c0_6 = arith.constant 0 : index
    %7 = vector.load %arg4[%c0_5, %c0_6] : memref<256x128xbf16, #tpu.memory_space<vmem>>, vector<256x128xbf16>
    %cst = arith.constant dense<0.000000e+00> : vector<16x128xf32>
    %8 = tpu.matmul %2, %7, %cst {dimension_numbers = #tpu.dot_dimension_numbers<[1], [0], [0], [1], [0, 0, 1, 1], [], []>} : vector<16x256xbf16>, vector<256x128xbf16>, vector<16x128xf32> -> vector<16x128xf32>
    %9 = arith.addf %6, %8 : vector<16x128xf32>
    %c0_7 = arith.constant 0 : index
    %c0_8 = arith.constant 0 : index
    %10 = vector.load %arg5[%c0_7, %c0_8] : memref<1x128xf32, #tpu.memory_space<vmem>>, vector<1x128xf32>
    %11 = vector.broadcast %10 : vector<1x128xf32> to vector<16x128xf32>
    %12 = arith.addf %9, %11 : vector<16x128xf32>
    %13 = math.tanh %12 : vector<16x128xf32>
    %14 = arith.truncf %13 : vector<16x128xf32> to vector<16x128xbf16>
    %c0_9 = arith.constant 0 : index
    %c0_10 = arith.constant 0 : index
    %15 = vector.load %arg6[%c0_9, %c0_10] : memref<128x256xbf16, #tpu.memory_space<vmem>>, vector<128x256xbf16>
    %cst_11 = arith.constant dense<0.000000e+00> : vector<16x256xf32>
    %16 = tpu.matmul %14, %15, %cst_11 {dimension_numbers = #tpu.dot_dimension_numbers<[1], [0], [0], [1], [0, 0, 1, 1], [], []>} : vector<16x128xbf16>, vector<128x256xbf16>, vector<16x256xf32> -> vector<16x256xf32>
    %c0_12 = arith.constant 0 : index
    %c0_13 = arith.constant 0 : index
    %17 = vector.load %arg7[%c0_12, %c0_13] : memref<1x256xf32, #tpu.memory_space<vmem>>, vector<1x256xf32>
    %18 = vector.broadcast %17 : vector<1x256xf32> to vector<16x256xf32>
    %19 = arith.addf %16, %18 : vector<16x256xf32>
    %20 = math.tanh %19 : vector<16x256xf32>
    %c0_14 = arith.constant 0 : index
    %c0_15 = arith.constant 0 : index
    %21 = vector.load %arg8[%c0_14, %c0_15] : memref<128x128xf32, #tpu.memory_space<vmem>>, vector<128x128xf32>
    %22 = vector.extract_strided_slice %1 {offsets = [0, 0], sizes = [16, 128], strides = [1, 1]} : vector<16x256xf32> to vector<16x128xf32>
    %cst_16 = arith.constant dense<0.000000e+00> : vector<16x128xf32>
    %23 = tpu.matmul %22, %21, %cst_16 {dimension_numbers = #tpu.dot_dimension_numbers<[1], [0], [0], [1], [0, 0, 1, 1], [], []>} : vector<16x128xf32>, vector<128x128xf32>, vector<16x128xf32> -> vector<16x128xf32>
    %24 = vector.extract_strided_slice %20 {offsets = [0, 0], sizes = [16, 128], strides = [1, 1]} : vector<16x256xf32> to vector<16x128xf32>
    %25 = arith.addf %23, %24 : vector<16x128xf32>
    %c0_17 = arith.constant 0 : index
    %c0_18 = arith.constant 0 : index
    %26 = vector.load %arg9[%c0_17, %c0_18] : memref<16x256xf32, #tpu.memory_space<vmem>>, vector<16x128xf32>
    tpu.vector_store %arg9[%c0_17, %c0_18], %25 {strides = array<i32>} : memref<16x256xf32, #tpu.memory_space<vmem>>, vector<16x128xf32>,
    %27 = vector.extract_strided_slice %1 {offsets = [0, 128], sizes = [16, 128], strides = [1, 1]} : vector<16x256xf32> to vector<16x128xf32>
    %cst_19 = arith.constant dense<0.000000e+00> : vector<16x128xf32>
    %28 = tpu.matmul %27, %21, %cst_19 {dimension_numbers = #tpu.dot_dimension_numbers<[1], [0], [0], [1], [0, 0, 1, 1], [], []>} : vector<16x128xf32>, vector<128x128xf32>, vector<16x128xf32> -> vector<16x128xf32>
    %29 = vector.extract_strided_slice %20 {offsets = [0, 128], sizes = [16, 128], strides = [1, 1]} : vector<16x256xf32> to vector<16x128xf32>
    %30 = arith.addf %28, %29 : vector<16x128xf32>
    %c0_20 = arith.constant 0 : index
    %c128 = arith.constant 128 : index
    %31 = vector.load %arg9[%c0_20, %c128] : memref<16x256xf32, #tpu.memory_space<vmem>>, vector<16x128xf32>
    tpu.vector_store %arg9[%c0_20, %c128], %30 {strides = array<i32>} : memref<16x256xf32, #tpu.memory_space<vmem>>, vector<16x128xf32>,
    return
  }
  func.func @transform_0(%arg0: i32) -> (i32, i32) {
    %c0_i32 = arith.constant 0 : i32
    %c0_i32_0 = arith.constant 0 : i32
    return %arg0, %c0_i32 : i32, i32
  }
  func.func @transform_1(%arg0: i32) -> (i32, i32) {
    %c0_i32 = arith.constant 0 : i32
    %c0_i32_0 = arith.constant 0 : i32
    return %arg0, %c0_i32 : i32, i32
  }
  func.func @transform_2(%arg0: i32) -> (i32, i32) {
    %c0_i32 = arith.constant 0 : i32
    %c0_i32_0 = arith.constant 0 : i32
    %c0_i32_1 = arith.constant 0 : i32
    return %c0_i32, %c0_i32_0 : i32, i32
  }
  func.func @transform_3(%arg0: i32) -> (i32, i32) {
    %c0_i32 = arith.constant 0 : i32
    %c0_i32_0 = arith.constant 0 : i32
    %c0_i32_1 = arith.constant 0 : i32
    return %c0_i32, %c0_i32_0 : i32, i32
  }
  func.func @transform_4(%arg0: i32) -> (i32, i32) {
    %c0_i32 = arith.constant 0 : i32
    %c0_i32_0 = arith.constant 0 : i32
    %c0_i32_1 = arith.constant 0 : i32
    return %c0_i32, %c0_i32_0 : i32, i32
  }
  func.func @transform_5(%arg0: i32) -> (i32, i32) {
    %c0_i32 = arith.constant 0 : i32
    %c0_i32_0 = arith.constant 0 : i32
    %c0_i32_1 = arith.constant 0 : i32
    return %c0_i32, %c0_i32_0 : i32, i32
  }
  func.func @transform_6(%arg0: i32) -> (i32, i32) {
    %c0_i32 = arith.constant 0 : i32
    %c0_i32_0 = arith.constant 0 : i32
    %c0_i32_1 = arith.constant 0 : i32
    return %c0_i32, %c0_i32_0 : i32, i32
  }
  func.func @transform_7(%arg0: i32) -> (i32, i32) {
    %c0_i32 = arith.constant 0 : i32
    %c0_i32_0 = arith.constant 0 : i32
    %c0_i32_1 = arith.constant 0 : i32
    return %c0_i32, %c0_i32_0 : i32, i32
  }
  func.func @transform_8(%arg0: i32) -> (i32, i32) {
    %c0_i32 = arith.constant 0 : i32
    %c0_i32_0 = arith.constant 0 : i32
    return %arg0, %c0_i32 : i32, i32
  }
}

module attributes {stable_mosaic.version = 11 : i64} {
  func.func @nnc_dynamics_kernel(%arg0: i32, %arg1: memref<16x1xf32, #tpu.memory_space<vmem>>, %arg2: memref<16x256xf32, #tpu.memory_space<vmem>>, %arg3: memref<1x128xf32, #tpu.memory_space<vmem>>, %arg4: memref<256x128xbf16, #tpu.memory_space<vmem>>, %arg5: memref<1x128xf32, #tpu.memory_space<vmem>>, %arg6: memref<128x256xbf16, #tpu.memory_space<vmem>>, %arg7: memref<1x256xf32, #tpu.memory_space<vmem>>, %arg8: memref<128x128xf32, #tpu.memory_space<vmem>>, %arg9: memref<16x256xf32, #tpu.memory_space<vmem>>) attributes {dimension_semantics = [#tpu.dimension_semantics<parallel>], iteration_bounds = array<i64: 1>, scalar_prefetch = 0 : i64, scratch_operands = 0 : i64, tpu.core_type = #tpu.core_type<tc>, window_params = [{transform_indices = @transform_0, window_bounds = array<i64: 16, 1>}, {transform_indices = @transform_1, window_bounds = array<i64: 16, 256>}, {pipeline_mode = #tpu.pipeline_mode<synchronous>, transform_indices = @transform_2, window_bounds = array<i64: 1, 128>}, {pipeline_mode = #tpu.pipeline_mode<synchronous>, transform_indices = @transform_3, window_bounds = array<i64: 256, 128>}, {pipeline_mode = #tpu.pipeline_mode<synchronous>, transform_indices = @transform_4, window_bounds = array<i64: 1, 128>}, {pipeline_mode = #tpu.pipeline_mode<synchronous>, transform_indices = @transform_5, window_bounds = array<i64: 128, 256>}, {pipeline_mode = #tpu.pipeline_mode<synchronous>, transform_indices = @transform_6, window_bounds = array<i64: 1, 256>}, {pipeline_mode = #tpu.pipeline_mode<synchronous>, transform_indices = @transform_7, window_bounds = array<i64: 128, 128>}, {transform_indices = @transform_8, window_bounds = array<i64: 16, 256>}]} {
    %c0 = arith.constant 0 : index
    %c0_0 = arith.constant 0 : index
    %0 = vector.load %arg1[%c0, %c0_0] : memref<16x1xf32, #tpu.memory_space<vmem>>, vector<16x1xf32>
    %c0_1 = arith.constant 0 : index
    %c0_2 = arith.constant 0 : index
    %1 = vector.load %arg2[%c0_1, %c0_2] : memref<16x256xf32, #tpu.memory_space<vmem>>, vector<16x256xf32>
    %2 = arith.truncf %1 : vector<16x256xf32> to vector<16x256xbf16>
    %c0_3 = arith.constant 0 : index
    %c0_4 = arith.constant 0 : index
    %3 = vector.load %arg3[%c0_3, %c0_4] : memref<1x128xf32, #tpu.memory_space<vmem>>, vector<1x128xf32>
    %4 = vector.broadcast %0 : vector<16x1xf32> to vector<16x128xf32>
    %5 = vector.broadcast %3 : vector<1x128xf32> to vector<16x128xf32>
    %6 = arith.mulf %4, %5 : vector<16x128xf32>
    %c0_5 = arith.constant 0 : index
    %c0_6 = arith.constant 0 : index
    %7 = vector.load %arg4[%c0_5, %c0_6] : memref<256x128xbf16, #tpu.memory_space<vmem>>, vector<256x128xbf16>
    %cst = arith.constant dense<0.000000e+00> : vector<16x128xf32>
    %8 = tpu.matmul %2, %7, %cst {dimension_numbers = #tpu.dot_dimension_numbers<[1], [0], [0], [1], [0, 0, 1, 1], [], []>} : vector<16x256xbf16>, vector<256x128xbf16>, vector<16x128xf32> -> vector<16x128xf32>
    %9 = arith.addf %6, %8 : vector<16x128xf32>
    %c0_7 = arith.constant 0 : index
    %c0_8 = arith.constant 0 : index
    %10 = vector.load %arg5[%c0_7, %c0_8] : memref<1x128xf32, #tpu.memory_space<vmem>>, vector<1x128xf32>
    %11 = vector.broadcast %10 : vector<1x128xf32> to vector<16x128xf32>
    %12 = arith.addf %9, %11 : vector<16x128xf32>
    %13 = math.tanh %12 : vector<16x128xf32>
    %14 = arith.truncf %13 : vector<16x128xf32> to vector<16x128xbf16>
    %c0_9 = arith.constant 0 : index
    %c0_10 = arith.constant 0 : index
    %15 = vector.load %arg6[%c0_9, %c0_10] : memref<128x256xbf16, #tpu.memory_space<vmem>>, vector<128x256xbf16>
    %cst_11 = arith.constant dense<0.000000e+00> : vector<16x256xf32>
    %16 = tpu.matmul %14, %15, %cst_11 {dimension_numbers = #tpu.dot_dimension_numbers<[1], [0], [0], [1], [0, 0, 1, 1], [], []>} : vector<16x128xbf16>, vector<128x256xbf16>, vector<16x256xf32> -> vector<16x256xf32>
    %c0_12 = arith.constant 0 : index
    %c0_13 = arith.constant 0 : index
    %17 = vector.load %arg7[%c0_12, %c0_13] : memref<1x256xf32, #tpu.memory_space<vmem>>, vector<1x256xf32>
    %18 = vector.broadcast %17 : vector<1x256xf32> to vector<16x256xf32>
    %19 = arith.addf %16, %18 : vector<16x256xf32>
    %20 = math.tanh %19 : vector<16x256xf32>
    %c0_14 = arith.constant 0 : index
    %c0_15 = arith.constant 0 : index
    %21 = vector.load %arg8[%c0_14, %c0_15] : memref<128x128xf32, #tpu.memory_space<vmem>>, vector<128x128xf32>
    %22 = vector.extract_strided_slice %1 {offsets = [0, 0], sizes = [16, 128], strides = [1, 1]} : vector<16x256xf32> to vector<16x128xf32>
    %cst_16 = arith.constant dense<0.000000e+00> : vector<16x128xf32>
    %23 = tpu.matmul %22, %21, %cst_16 {dimension_numbers = #tpu.dot_dimension_numbers<[1], [0], [0], [1], [0, 0, 1, 1], [], []>} : vector<16x128xf32>, vector<128x128xf32>, vector<16x128xf32> -> vector<16x128xf32>
    %24 = vector.extract_strided_slice %20 {offsets = [0, 0], sizes = [16, 128], strides = [1, 1]} : vector<16x256xf32> to vector<16x128xf32>
    %25 = arith.addf %23, %24 : vector<16x128xf32>
    %c0_17 = arith.constant 0 : index
    %c0_18 = arith.constant 0 : index
    %26 = vector.load %arg9[%c0_17, %c0_18] : memref<16x256xf32, #tpu.memory_space<vmem>>, vector<16x128xf32>
    tpu.vector_store %arg9[%c0_17, %c0_18], %25 {strides = array<i32>} : memref<16x256xf32, #tpu.memory_space<vmem>>, vector<16x128xf32>,
    %27 = vector.extract_strided_slice %1 {offsets = [0, 128], sizes = [16, 128], strides = [1, 1]} : vector<16x256xf32> to vector<16x128xf32>
    %cst_19 = arith.constant dense<0.000000e+00> : vector<16x128xf32>
    %28 = tpu.matmul %27, %21, %cst_19 {dimension_numbers = #tpu.dot_dimension_numbers<[1], [0], [0], [1], [0, 0, 1, 1], [], []>} : vector<16x128xf32>, vector<128x128xf32>, vector<16x128xf32> -> vector<16x128xf32>
    %29 = vector.extract_strided_slice %20 {offsets = [0, 128], sizes = [16, 128], strides = [1, 1]} : vector<16x256xf32> to vector<16x128xf32>
    %30 = arith.addf %28, %29 : vector<16x128xf32>
    %c0_20 = arith.constant 0 : index
    %c128 = arith.constant 128 : index
    %31 = vector.load %arg9[%c0_20, %c128] : memref<16x256xf32, #tpu.memory_space<vmem>>, vector<16x128xf32>
    tpu.vector_store %arg9[%c0_20, %c128], %30 {strides = array<i32>} : memref<16x256xf32, #tpu.memory_space<vmem>>, vector<16x128xf32>,
    return
  }
  func.func @transform_0(%arg0: i32) -> (i32, i32) {
    %c0_i32 = arith.constant 0 : i32
    %c0_i32_0 = arith.constant 0 : i32
    return %arg0, %c0_i32 : i32, i32
  }
  func.func @transform_1(%arg0: i32) -> (i32, i32) {
    %c0_i32 = arith.constant 0 : i32
    %c0_i32_0 = arith.constant 0 : i32
    return %arg0, %c0_i32 : i32, i32
  }
  func.func @transform_2(%arg0: i32) -> (i32, i32) {
    %c0_i32 = arith.constant 0 : i32
    %c0_i32_0 = arith.constant 0 : i32
    %c0_i32_1 = arith.constant 0 : i32
    return %c0_i32, %c0_i32_0 : i32, i32
  }
  func.func @transform_3(%arg0: i32) -> (i32, i32) {
    %c0_i32 = arith.constant 0 : i32
    %c0_i32_0 = arith.constant 0 : i32
    %c0_i32_1 = arith.constant 0 : i32
    return %c0_i32, %c0_i32_0 : i32, i32
  }
  func.func @transform_4(%arg0: i32) -> (i32, i32) {
    %c0_i32 = arith.constant 0 : i32
    %c0_i32_0 = arith.constant 0 : i32
    %c0_i32_1 = arith.constant 0 : i32
    return %c0_i32, %c0_i32_0 : i32, i32
  }
  func.func @transform_5(%arg0: i32) -> (i32, i32) {
    %c0_i32 = arith.constant 0 : i32
    %c0_i32_0 = arith.constant 0 : i32
    %c0_i32_1 = arith.constant 0 : i32
    return %c0_i32, %c0_i32_0 : i32, i32
  }
  func.func @transform_6(%arg0: i32) -> (i32, i32) {
    %c0_i32 = arith.constant 0 : i32
    %c0_i32_0 = arith.constant 0 : i32
    %c0_i32_1 = arith.constant 0 : i32
    return %c0_i32, %c0_i32_0 : i32, i32
  }
  func.func @transform_7(%arg0: i32) -> (i32, i32) {
    %c0_i32 = arith.constant 0 : i32
    %c0_i32_0 = arith.constant 0 : i32
    %c0_i32_1 = arith.constant 0 : i32
    return %c0_i32, %c0_i32_0 : i32, i32
  }
  func.func @transform_8(%arg0: i32) -> (i32, i32) {
    %c0_i32 = arith.constant 0 : i32
    %c0_i32_0 = arith.constant 0 : i32
    return %arg0, %c0_i32 : i32, i32
  }
}

</mosaic_0001>

<bundles_post_ra>
// kernel: tpu_custom_call.1
= control target key start
LH: loop header
LB: loop body
LE: loop exit
PB: predicated region body
PF: predicated region fallthrough
CT: control target
= control target key end

     0   :  { %13 = vsyncpa [#allocation3], 0  ;;  %s1217_s0 = inlined_call_operand.vmem [shape: f32[16,1], index: 0, kind: input, shape index: {}]   ;;  %s1218_s1 = inlined_call_operand.hbm [shape: f32[16,256], index: 1, kind: input, shape index: {}]   ;;  %s1219_s2 = inlined_call_operand.vmem [shape: f32[1,128], index: 2, kind: input, shape index: {}]   ;;  %s1220_s3 = inlined_call_operand.hbm [shape: bf16[256,128], index: 3, kind: input, shape index: {}]   ;;  %s1221_s4 = inlined_call_operand.vmem [shape: f32[1,128], index: 4, kind: input, shape index: {}]   ;;  %s1222_s5 = inlined_call_operand.hbm [shape: bf16[128,256], index: 5, kind: input, shape index: {}]   ;;  %s1223_s6 = inlined_call_operand.vmem [shape: f32[1,256], index: 6, kind: input, shape index: {}]   ;;  %s1224_s7 = inlined_call_operand.hbm [shape: f32[128,128], index: 7, kind: input, shape index: {}]   ;;  %s1225_s8 = inlined_call_operand.hbm [shape: f32[16,256], index: 8, kind: output, shape index: {}]  }
   0x1   :  { %14 = vsyncpa [#allocation6], 0 }
   0x2   :  { %15 = vsyncpa [#allocation9], 0 }
   0x3   :  { %16 = vsyncpa [#allocation4], 0  ;;  %s1049_s27 = smov [#allocation5]   ;;  %s931_s9 = scalar_lea.hbm %s1220_s3, 2048 }
   0x4   :  { %s38_s28 = sshll.u32 %s1049_s27, 4  ;;  %p932_p0 = scmp.ne.s32.totalorder %s1220_s3, %s931_s9  ;;  %s39_s28 = int_to_ptr.vmem [resolvable:$true] %s38_s28 }
   0x5   :  { %p935_p1 = scmp.lt.u32.totalorder %s931_s9, %s1220_s3 }
   0x7   :  { %p937_p2 = pnand %p935_p1, %p932_p0 }
   0x9   :  { %940 = shalt.err (!%p937_p2)
}
   0xa   :  { %s941_s14 = scalar_lea.vmem %s39_s28, 2048  ;;  %p946_p4 = scmp.lt.s32.totalorder %s39_s28, %s39_s28 }
   0xb   :  { %p942_p3 = scmp.ne.s32.totalorder %s39_s28, %s941_s14  ;;  %p947_p5 = scmp.lt.s32.totalorder %s941_s14, %s941_s14 }
   0xd   :  { %p948_p6 = por %p947_p5, %p946_p4 }
   0xf   :  { %p949_p7 = pnand %p948_p6, %p942_p3 }
  0x11   :  { %952 = shalt.err (!%p949_p7)
}
  0x12   :  { %s1050_s15 = smov 64   ;;  %s1051_s16 = smov 4  }
  0x13   :  { %44 = dma.hbm_to_vmem [thread:$0]  %s1220_s3, 2048, %s39_s28, [#allocation6], %s1050_s15, %s1050_s15, %s1051_s16  }
  0x14   :  { %s1052_s19 = smov [#allocation2]   ;;  %s953_s23 = scalar_lea.hbm %s1218_s1, 512 }
  0x15   :  { %s24_s20 = sshll.u32 %s1052_s19, 4  ;;  %p954_p8 = scmp.ne.s32.totalorder %s1218_s1, %s953_s23  ;;  %s25_s20 = int_to_ptr.vmem [resolvable:$true] %s24_s20 }
  0x16   :  { %p957_p9 = scmp.lt.u32.totalorder %s953_s23, %s1218_s1 }
  0x18   :  { %p959_p10 = pnand %p957_p9, %p954_p8 }
  0x1a   :  { %962 = shalt.err (!%p959_p10)
}
  0x1b   :  { %s963_s29 = scalar_lea.vmem %s25_s20, 512  ;;  %p968_p12 = scmp.lt.s32.totalorder %s25_s20, %s25_s20 }
  0x1c   :  { %p964_p11 = scmp.ne.s32.totalorder %s25_s20, %s963_s29  ;;  %p969_p13 = scmp.lt.s32.totalorder %s963_s29, %s963_s29 }
  0x1e   :  { %p970_p0 = por %p969_p13, %p968_p12 }
  0x20   :  { %p971_p1 = pnand %p970_p0, %p964_p11 }
  0x22   :  { %974 = shalt.err (!%p971_p1)
}
  0x23   :  { %s1053_s3 = smov 256   ;;  %s1054_s28 = smov 16  }
  0x24   :  { %30 = dma.hbm_to_vmem [thread:$0]  %s1218_s1, 512, %s25_s20, [#allocation3], %s1053_s3, %s1053_s3, %s1054_s28  }
  0x25   :  { %s1055_s10 = smov [#allocation7]   ;;  %s975_s14 = scalar_lea.hbm %s1222_s5, 2048 }
  0x26   :  { %s52_s11 = sshll.u32 %s1055_s10, 4  ;;  %p976_p2 = scmp.ne.s32.totalorder %s1222_s5, %s975_s14  ;;  %s53_s11 = int_to_ptr.vmem [resolvable:$true] %s52_s11 }
  0x27   :  { %p979_p3 = scmp.lt.u32.totalorder %s975_s14, %s1222_s5 }
  0x29   :  { %p981_p4 = pnand %p979_p3, %p976_p2 }
  0x2b   :  { %984 = shalt.err (!%p981_p4)
}
  0x2c   :  { %s985_s19 = scalar_lea.vmem %s53_s11, 2048  ;;  %p990_p6 = scmp.lt.s32.totalorder %s53_s11, %s53_s11 }
  0x2d   :  { %p986_p5 = scmp.ne.s32.totalorder %s53_s11, %s985_s19  ;;  %p991_p7 = scmp.lt.s32.totalorder %s985_s19, %s985_s19 }
  0x2f   :  { %p992_p8 = por %p991_p7, %p990_p6 }
  0x31   :  { %p993_p9 = pnand %p992_p8, %p986_p5 }
  0x33   :  { %996 = shalt.err (!%p993_p9)
}
  0x34   :  { %s1056_s1 = smov 128   ;;  %s1057_s20 = smov 8  }
  0x35   :  { %58 = dma.hbm_to_vmem [thread:$0]  %s1222_s5, 2048, %s53_s11, [#allocation6], %s1056_s1, %s1056_s1, %s1057_s20  }
  0x36   :  { %s1058_s23 = smov [#allocation8]   ;;  %s997_s27 = scalar_lea.hbm %s1224_s7, 2048 }
  0x37   :  { %s66_s24 = sshll.u32 %s1058_s23, 4  ;;  %p998_p10 = scmp.ne.s32.totalorder %s1224_s7, %s997_s27  ;;  %s67_s24 = int_to_ptr.vmem [resolvable:$true] %s66_s24 }
  0x38   :  { %p1001_p11 = scmp.lt.u32.totalorder %s997_s27, %s1224_s7 }
  0x3a   :  { %p1003_p12 = pnand %p1001_p11, %p998_p10 }
  0x3c   :  { %1006 = shalt.err (!%p1003_p12)
}
  0x3d   :  { %s1007_s12 = scalar_lea.vmem %s67_s24, 2048  ;;  %p1012_p0 = scmp.lt.s32.totalorder %s67_s24, %s67_s24 }
  0x3e   :  { %p1008_p13 = scmp.ne.s32.totalorder %s67_s24, %s1007_s12  ;;  %p1013_p1 = scmp.lt.s32.totalorder %s1007_s12, %s1007_s12 }
  0x40   :  { %p1014_p2 = por %p1013_p1, %p1012_p0 }
  0x42   :  { %p1015_p3 = pnand %p1014_p2, %p1008_p13 }
  0x44   :  { %1018 = shalt.err (!%p1015_p3)
}
  0x45   :  { %72 = dma.hbm_to_vmem [thread:$0]  %s1224_s7, 2048, %s67_s24, [#allocation9], %s1056_s1, %s1056_s1, %s1057_s20  }
  0x46   :  { %1041 = dma.done.wait [#allocation3], 512  }
  0x47   :  { %1042 = vsyncadd [#allocation3], 4294966784 }
  0x48   :  { %1043 = dma.done.wait [#allocation6], 4096  }
  0x49   :  { %1044 = vsyncadd [#allocation6], 4294963200 }
  0x4a   :  { %1045 = dma.done.wait [#allocation9], 2048  }
  0x4b   :  { %1046 = vsyncadd [#allocation9], 4294965248  ;;  %v1059_v0 = vmov 0   ;;  %v879_v1 = vld [vmem:[#allocation5 + $0x40] sm:$0xff]   ;;  %v881_v3 = vld [vmem:[#allocation5 + $0x48] sm:$0xff]  }
  0x4c   :  { %878 = vset.pattern.permute.xlu0 %v1059_v0  ;;  %436 = vmatprep.mubr.bf16.mxu1 %v1059_v0  ;;  %v880_v2 = vld [vmem:[#allocation5] sm:$0xff]   ;;  %v882_v4 = vld [vmem:[#allocation5 + $0x8] sm:$0xff]   ;;  %v883_v5 = vld [vmem:[#allocation5 + $0x50] sm:$0xff]  }
  0x4d   :  { %674 = vmatprep.subr.bf16.mxu0 %v879_v1  ;;  %v884_v6 = vld [vmem:[#allocation5 + $0x10] sm:$0xff]   ;;  %v885_v7 = vld [vmem:[#allocation5 + $0x58] sm:$0xff]   ;;  %v887_v9 = vld [vmem:[#allocation5 + $0x60] sm:$0xff]  }
  0x4e   :  { %675 = vmatpush3.bf16.msra.mxu0 %v880_v2  ;;  %v886_v8 = vld [vmem:[#allocation5 + $0x18] sm:$0xff]   ;;  %v888_v10 = vld [vmem:[#allocation5 + $0x20] sm:$0xff]   ;;  %v889_v11 = vld [vmem:[#allocation5 + $0x68] sm:$0xff]  }
  0x4f   :  { %676 = vmatprep.subr.bf16.mxu0 %v881_v3  ;;  %v1157_v12 = vld [vmem:[#allocation2 + $0x8] sm:$0xff]  ;;  %v1159_v13 = vld [vmem:[#allocation2 + $0x18] sm:$0xff]  ;;  %v86_v16 = vld [vmem:[%s1217_s0] sm:$0xff] }
  0x50   :  { %v890_v14 = vld [vmem:[#allocation5 + $0x28] sm:$0xff]   ;;  %v93_v15 = vpack.c.bf16 %v1159_v13, %v1157_v12  ;;  %97 = vperm.xlu0 %878, %v86_v16   ;;  %v891_v20 = vld [vmem:[#allocation5 + $0x70] sm:$0xff]   ;;  %v893_v24 = vld [vmem:[#allocation5 + $0x78] sm:$0xff]  }
  0x51   :  { %v87_v17 = vld [vmem:[%s1217_s0 + $0x8] sm:$0xff]  ;;  %v898_v21 = vld [vmem:[#allocation7 + $0x14] ss:$8 sps:$4 sm:$0xff]   ;;  %v900_v23 = vld [vmem:[#allocation7 + $0x10] ss:$8 sps:$4 sm:$0xff]  }
  0x52   :  { %677 = vmatpush3.bf16.msra.mxu0 %v882_v4  ;;  %v895_v18 = vld [vmem:[#allocation7 + $0x4] ss:$8 sps:$4 sm:$0xff]   ;;  %273 = vmatprep.mubr.bf16.mxu0 %v93_v15  ;;  %v897_v19 = vld [vmem:[#allocation7] ss:$8 sps:$4 sm:$0xff]   ;;  %v892_v22 = vld [vmem:[#allocation5 + $0x30] sm:$0xff]  }
  0x53   :  { %678 = vmatprep.subr.bf16.mxu0 %v883_v5  ;;  %404 = vmatprep.subr.bf16.mxu1 %v895_v18  ;;  %v901_v25 = vld [vmem:[#allocation7 + $0x24] ss:$8 sps:$4 sm:$0xff]   ;;  %v903_v26 = vld [vmem:[#allocation7 + $0x20] ss:$8 sps:$4 sm:$0xff]   ;;  %v894_v27 = vld [vmem:[#allocation5 + $0x38] sm:$0xff]  }
  0x54   :  { %405 = vmatpush1.bf16.msra.mxu1 %v897_v19  ;;  %102 = vperm.xlu0 %878, %v87_v17   ;;  %v88_v28 = vld [vmem:[#allocation2] sm:$0xff]  ;;  %v1169_v29 = vld [vmem:[#allocation2 + $0x10] sm:$0xff]  ;;  %v452_v33 = vld [vmem:[#allocation8 + $0x8] sm:$0xff] }
  0x55   :  { %406 = vmatprep.subr.bf16.mxu1 %v898_v21  ;;  %v92_v30 = vpack.c.bf16 %v1169_v29, %v88_v28  ;;  %v904_v31 = vld [vmem:[#allocation7 + $0x34] ss:$8 sps:$4 sm:$0xff]   ;;  %v451_v32 = vld [vmem:[#allocation8] sm:$0xff]  ;;  %v906_v34 = vld [vmem:[#allocation7 + $0x30] ss:$8 sps:$4 sm:$0xff]  }
  0x56   :  { %679 = vmatpush3.bf16.msra.mxu0 %v884_v6  ;;  %v1172_v35 = vpack.c.bf16 %v452_v33, %v451_v32  ;;  %v907_v36 = vld [vmem:[#allocation7 + $0x44] ss:$8 sps:$4 sm:$0xff]   ;;  %v453_v37 = vld [vmem:[#allocation8 + $0x10] sm:$0xff]  ;;  %v909_v38 = vld [vmem:[#allocation7 + $0x40] ss:$8 sps:$4 sm:$0xff]  }
  0x57   :  { %680 = vmatprep.subr.bf16.mxu0 %v885_v7  ;;  %v454_v39 = vld [vmem:[#allocation8 + $0x18] sm:$0xff]  ;;  %v455_v42 = vld [vmem:[#allocation8 + $0x20] sm:$0xff]  ;;  %v456_v43 = vld [vmem:[#allocation8 + $0x28] sm:$0xff] }
  0x58   :  { %407 = vmatpush1.bf16.msra.mxu1 %v900_v23  ;;  %v1176_v40 = vpack.c.bf16 %v454_v39, %v453_v37  ;;  %v910_v41 = vld [vmem:[#allocation7 + $0x54] ss:$8 sps:$4 sm:$0xff]   ;;  %v912_v44 = vld [vmem:[#allocation7 + $0x50] ss:$8 sps:$4 sm:$0xff]   ;;  %v1180_v45 = vpack.c.bf16 %v456_v43, %v455_v42  ;;  %v913_v46 = vld [vmem:[#allocation7 + $0x64] ss:$8 sps:$4 sm:$0xff]   ;;  %v314_v23 = vlaneseq }
  0x59   :  { %408 = vmatprep.subr.bf16.mxu1 %v901_v25  ;;  %v457_v47 = vld [vmem:[#allocation8 + $0x30] sm:$0xff]  ;;  %v915_v48 = vld [vmem:[#allocation7 + $0x60] ss:$8 sps:$4 sm:$0xff]   ;;  %v458_v49 = vld [vmem:[#allocation8 + $0x38] sm:$0xff] }
  0x5a   :  { %681 = vmatpush3.bf16.msra.mxu0 %v886_v8  ;;  %v814_v50 = vpack.c.bf16 %v458_v49, %v457_v47  ;;  %v916_v51 = vld [vmem:[#allocation7 + $0x74] ss:$8 sps:$4 sm:$0xff]   ;;  %v459_v52 = vld [vmem:[#allocation8 + $0x40] sm:$0xff]  ;;  %v460_v53 = vld [vmem:[#allocation8 + $0x48] sm:$0xff] }
  0x5b   :  { %682 = vmatprep.subr.bf16.mxu0 %v887_v9  ;;  %v818_v54 = vpack.c.bf16 %v460_v53, %v459_v52  ;;  %v918_v55 = vld [vmem:[#allocation7 + $0x70] ss:$8 sps:$4 sm:$0xff]   ;;  %v463_v59 = vld [vmem:[#allocation8 + $0x60] sm:$0xff]  ;;  %v464_v60 = vld [vmem:[#allocation8 + $0x68] sm:$0xff] }
  0x5c   :  { %409 = vmatpush1.bf16.msra.mxu1 %v903_v26  ;;  %v461_v56 = vld [vmem:[#allocation8 + $0x50] sm:$0xff]  ;;  %v462_v57 = vld [vmem:[#allocation8 + $0x58] sm:$0xff]  ;;  %v826_v61 = vpack.c.bf16 %v464_v60, %v463_v59  ;;  %v640_v2 = vld [vmem:[%s1219_s2] ss:$0 sm:$0xff] }
  0x5d   :  { %410 = vmatprep.subr.bf16.mxu1 %v904_v31  ;;  %v822_v58 = vpack.c.bf16 %v462_v57, %v461_v56  ;;  %v465_v62 = vld [vmem:[#allocation8 + $0x70] sm:$0xff]  ;;  %v466_v63 = vld [vmem:[#allocation8 + $0x78] sm:$0xff]  ;;  %v657_v9 = vld [vmem:[%s1221_s4] ss:$0 sm:$0xff] }
  0x5e   :  { %683 = vmatpush3.bf16.msra.mxu0 %v888_v10  ;;  %v830_v0 = vpack.c.bf16 %v466_v63, %v465_v62  ;;  %v312_v26 = vld [vmem:[%s1223_s6] sm:$0x3]  ;;  %s1060_s6 = smov [#allocation10]  }
  0x5f   :  { %684 = vmatprep.subr.bf16.mxu0 %v889_v11  ;;  %s626_s19 = sshll.u32 %s1060_s6, 4  ;;  %s627_s19 = int_to_ptr.vmem [resolvable:$true] %s626_s19 }
  0x60   :  { %411 = vmatpush1.bf16.msra.mxu1 %v906_v34  ;;  %s1019_s1 = scalar_lea.vmem %s627_s19, 512  ;;  %p1024_p5 = scmp.lt.s32.totalorder %s627_s19, %s627_s19 }
  0x61   :  { %412 = vmatprep.subr.bf16.mxu1 %v907_v36  ;;  %p1020_p4 = scmp.ne.s32.totalorder %s627_s19, %s1019_s1  ;;  %p1025_p6 = scmp.lt.s32.totalorder %s1019_s1, %s1019_s1 }
  0x62   :  { %685 = vmatpush3.bf16.msra.mxu0 %v890_v14 }
  0x63   :  { %686 = vmatprep.subr.bf16.mxu0 %v891_v20  ;;  %p1026_p7 = por %p1025_p6, %p1024_p5 }
  0x64   :  { %413 = vmatpush1.bf16.msra.mxu1 %v909_v38 }
  0x65   :  { %414 = vmatprep.subr.bf16.mxu1 %v910_v41  ;;  %p1027_p8 = pnand %p1026_p7, %p1020_p4 }
  0x66   :  { %687 = vmatpush3.bf16.msra.mxu0 %v892_v22 }
  0x67   :  { %688 = vmatprep.subr.bf16.mxu0 %v893_v24  ;;  %v315_v24 = vshrl.u32 %v314_v23, 7 }
  0x68   :  { %415 = vmatpush1.bf16.msra.mxu1 %v912_v44 }
  0x69   :  { %416 = vmatprep.subr.bf16.mxu1 %v913_v46  ;;  %v316_v25 = vsub.s32 0, %v315_v24  ;;  %v320_v34 = vsub.s32 1, %v315_v24 }
  0x6a   :  { %689 = vmatpush3.bf16.msra.mxu0 %v894_v27 }
  0x6b   :  { %803 = vmatprep.subr.bf16.mxu0 %v1172_v35  ;;  %v317_v27 = vrot.slane %v312_v26, %v316_v25  ;;  %v321_v37 = vrot.slane %v312_v26, %v320_v34 }
  0x6c   :  { %417 = vmatpush1.bf16.msra.mxu1 %v915_v48 }
  0x6d   :  { %274 = vmatmul.mubr.bf16.vlgmr.msra.gmra.mrb[0].mxu0 %v92_v30  ;;  %418 = vmatprep.subr.bf16.mxu1 %v916_v51 }
  0x6e   :  { %764 = vmatprep.mubr.f32.mxu0 %v88_v28  ;;  %805 = vmatpush3.bf16.msra.mxu0 %v1172_v35 }
  0x6f   :  { %807 = vmatprep.subr.bf16.mxu0 %v1176_v40 }
  0x70   :  { %419 = vmatpush1.bf16.msra.mxu1 %v918_v55 }
  0x71   :  { %835 = vmatprep.subr.bf16.mxu1 %v1172_v35 }
  0x72   :  { %809 = vmatpush3.bf16.msra.mxu0 %v1176_v40 }
  0x73   :  { %811 = vmatprep.subr.bf16.mxu0 %v1180_v45 }
  0x76   :  { %813 = vmatpush3.bf16.msra.mxu0 %v1180_v45 }
  0x77   :  { %815 = vmatprep.subr.bf16.mxu0 %v814_v50 }
  0x7a   :  { %817 = vmatpush3.bf16.msra.mxu0 %v814_v50 }
  0x7b   :  { %819 = vmatprep.subr.bf16.mxu0 %v818_v54 }
  0x7e   :  { %821 = vmatpush3.bf16.msra.mxu0 %v818_v54 }
  0x7f   :  { %823 = vmatprep.subr.bf16.mxu0 %v822_v58 }
  0x82   :  { %825 = vmatpush3.bf16.msra.mxu0 %v822_v58 }
  0x83   :  { %827 = vmatprep.subr.bf16.mxu0 %v826_v61 }
  0x86   :  { %829 = vmatpush3.bf16.msra.mxu0 %v826_v61 }
  0x87   :  { %831 = vmatprep.subr.bf16.mxu0 %v830_v0 }
  0x8a   :  { %833 = vmatpush3.bf16.msra.mxu0 %v830_v0 }
  0x8d   :  { %765 = vmatmul.mubr.f32.vlgmr.msra.gmra.mrb[4].mxu0 %v1169_v29 }
  0xcf   :  { %v98_v1 = vpop.permute.xlu0 %97 }
  0xd0   :  { %v111_v6 = vmul.f32 %v640_v2, %v98_v1 }
  0xd3   :  { %v103_v4 = vpop.permute.xlu0 %102 }
  0xd4   :  { %v112_v11 = vmul.f32 %v640_v2, %v103_v4 }
 0x140   :  { %v690_v3 = vpop.f32.mrb[0].mxu0 }
 0x141   :  { %v691_v5 = vpop.f32.mrb[1].mxu0 }
 0x142   :  { %v692_v7 = vadd.f32 %v691_v5, %v690_v3  ;;  %v693_v8 = vpop.f32.mrb[2].mxu0 }
 0x143   :  { %v694_v10 = vpop.f32.mrb[3].mxu0 }
 0x144   :  { %v282_v14 = vadd.f32 %v692_v7, %v111_v6  ;;  %v695_v15 = vadd.f32 %v694_v10, %v693_v8 }
 0x146   :  { %v291_v16 = vadd.f32 %v657_v9, %v282_v14  ;;  %v283_v17 = vadd.f32 %v695_v15, %v112_v11 }
 0x148   :  { %v292_v18 = vadd.f32 %v657_v9, %v283_v17  ;;  %919 = vtanh.f32 %v291_v16 }
 0x14a   :  { %921 = vtanh.f32 %v292_v18 }
 0x152   :  { %v920_v19 = vpop.eup %919 }
 0x154   :  { %v922_v20 = vpop.eup %921 }
 0x155   :  { %v295_v21 = vpack.c.bf16 %v922_v20, %v920_v19 }
 0x157   :  { %437 = vmatmul.mubr.bf16.vlgmr.msra.gmra.mrb[0].mxu1 %v295_v21 }
 0x158   :  { %837 = vmatpush3.bf16.msra.mxu1 %v1172_v35  ;;  %799 = vmatprep.mubr.f32.mxu1 %v1157_v12 }
 0x159   :  { %839 = vmatprep.subr.bf16.mxu1 %v1176_v40 }
 0x15c   :  { %841 = vmatpush3.bf16.msra.mxu1 %v1176_v40 }
 0x15d   :  { %843 = vmatprep.subr.bf16.mxu1 %v1180_v45 }
 0x160   :  { %845 = vmatpush3.bf16.msra.mxu1 %v1180_v45  ;;  %v766_v12 = vpop.f32.mrb[4].mxu0 }
 0x161   :  { %847 = vmatprep.subr.bf16.mxu1 %v814_v50  ;;  %v533_v22 = vpop.f32.mrb[5].mxu0 }
 0x164   :  { %849 = vmatpush3.bf16.msra.mxu1 %v814_v50 }
 0x165   :  { %851 = vmatprep.subr.bf16.mxu1 %v818_v54 }
 0x168   :  { %853 = vmatpush3.bf16.msra.mxu1 %v818_v54 }
 0x169   :  { %855 = vmatprep.subr.bf16.mxu1 %v822_v58 }
 0x16c   :  { %857 = vmatpush3.bf16.msra.mxu1 %v822_v58 }
 0x16d   :  { %859 = vmatprep.subr.bf16.mxu1 %v826_v61 }
 0x170   :  { %861 = vmatpush3.bf16.msra.mxu1 %v826_v61 }
 0x171   :  { %863 = vmatprep.subr.bf16.mxu1 %v830_v0 }
 0x174   :  { %865 = vmatpush3.bf16.msra.mxu1 %v830_v0 }
 0x177   :  { %800 = vmatmul.mubr.f32.vlgmr.msra.gmra.mrb[4].mxu1 %v1159_v13 }
 0x22a   :  { %v438_v28 = vpop.f32.mrb[0].mxu1 }
 0x22b   :  { %v439_v29 = vadd.f32 %v438_v28, %v317_v27  ;;  %v440_v30 = vpop.f32.mrb[1].mxu1 }
 0x22c   :  { %v442_v31 = vpop.f32.mrb[2].mxu1  ;;  %v441_v40 = vadd.f32 %v440_v30, %v321_v37 }
 0x22d   :  { %923 = vtanh.f32 %v439_v29  ;;  %v443_v32 = vadd.f32 %v442_v31, %v317_v27  ;;  %v444_v33 = vpop.f32.mrb[3].mxu1 }
 0x22e   :  { %v445_v39 = vadd.f32 %v444_v33, %v321_v37 }
 0x22f   :  { %925 = vtanh.f32 %v443_v32 }
 0x230   :  { %927 = vtanh.f32 %v445_v39 }
 0x231   :  { %929 = vtanh.f32 %v441_v40 }
 0x237   :  { %v924_v13 = vpop.eup %923 }
 0x238   :  { %v534_v35 = vadd.f32 %v924_v13, %v533_v22 }
 0x239   :  { %v926_v36 = vpop.eup %925 }
 0x23a   :  { %v539_v38 = vadd.f32 %v926_v36, %v766_v12  ;;  %542 = vst [vmem:[#allocation10] sm:$0xff] %v534_v35  ;;  %v928_v41 = vpop.eup %927 }
 0x23b   :  { %v930_v43 = vpop.eup %929 }
 0x23c   :  { %543 = vst [vmem:[#allocation10 + $0x10] sm:$0xff] %v539_v38 }
 0x24a   :  { %v801_v42 = vpop.f32.mrb[4].mxu1 }
 0x24b   :  { %v616_v44 = vadd.f32 %v928_v41, %v801_v42  ;;  %v610_v45 = vpop.f32.mrb[5].mxu1 }
 0x24c   :  { %v611_v46 = vadd.f32 %v930_v43, %v610_v45 }
 0x24d   :  { %620 = vst [vmem:[#allocation10 + $0x18] sm:$0xff] %v616_v44 }
 0x24e   :  { %619 = vst [vmem:[#allocation10 + $0x8] sm:$0xff] %v611_v46 }
 0x24f   :  { %1030 = shalt.err (!%p1027_p8)
}
 0x250   :  { %s1031_s22 = scalar_lea.hbm %s1225_s8, 512 }
 0x251   :  { %p1032_p9 = scmp.ne.s32.totalorder %s1225_s8, %s1031_s22  ;;  %p1035_p10 = scmp.lt.u32.totalorder %s1031_s22, %s1225_s8 }
 0x253   :  { %p1037_p11 = pnand %p1035_p10, %p1032_p9 }
 0x255   :  { %1040 = shalt.err (!%p1037_p11)
}
 0x256   :  { %632 = dma.vmem_to_hbm [thread:$0]  %s627_s19, 512, %s1225_s8, [#allocation4], %s1053_s3, %s1053_s3, %s1054_s28  }
 0x257   :  { %1047 = dma.done.wait [#allocation4], 512  }
 0x258   :  { %1048 = vsyncadd [#allocation4], 4294966784 }
 0x259   :  { %636 = vsyncpa [#allocation3], 1 }
 0x25a   :  { %637 = vsyncpa [#allocation6], 1 }
 0x25b   :  { %638 = vsyncpa [#allocation9], 1 }
 0x25c   :  { %639 = vsyncpa [#allocation4], 1 }

// kernel: tpu_custom_call.1
= control target key start
LH: loop header
LB: loop body
LE: loop exit
PB: predicated region body
PF: predicated region fallthrough
CT: control target
= control target key end

     0   :  { %13 = vsyncpa [#allocation3], 0  ;;  %s1217_s0 = inlined_call_operand.vmem [shape: f32[16,1], index: 0, kind: input, shape index: {}]   ;;  %s1218_s1 = inlined_call_operand.hbm [shape: f32[16,256], index: 1, kind: input, shape index: {}]   ;;  %s1219_s2 = inlined_call_operand.vmem [shape: f32[1,128], index: 2, kind: input, shape index: {}]   ;;  %s1220_s3 = inlined_call_operand.hbm [shape: bf16[256,128], index: 3, kind: input, shape index: {}]   ;;  %s1221_s4 = inlined_call_operand.vmem [shape: f32[1,128], index: 4, kind: input, shape index: {}]   ;;  %s1222_s5 = inlined_call_operand.hbm [shape: bf16[128,256], index: 5, kind: input, shape index: {}]   ;;  %s1223_s6 = inlined_call_operand.vmem [shape: f32[1,256], index: 6, kind: input, shape index: {}]   ;;  %s1224_s7 = inlined_call_operand.hbm [shape: f32[128,128], index: 7, kind: input, shape index: {}]   ;;  %s1225_s8 = inlined_call_operand.hbm [shape: f32[16,256], index: 8, kind: output, shape index: {}]  }
   0x1   :  { %14 = vsyncpa [#allocation6], 0 }
   0x2   :  { %15 = vsyncpa [#allocation9], 0 }
   0x3   :  { %16 = vsyncpa [#allocation4], 0  ;;  %s1049_s27 = smov [#allocation5]   ;;  %s931_s9 = scalar_lea.hbm %s1220_s3, 2048 }
   0x4   :  { %s38_s28 = sshll.u32 %s1049_s27, 4  ;;  %p932_p0 = scmp.ne.s32.totalorder %s1220_s3, %s931_s9  ;;  %s39_s28 = int_to_ptr.vmem [resolvable:$true] %s38_s28 }
   0x5   :  { %p935_p1 = scmp.lt.u32.totalorder %s931_s9, %s1220_s3 }
   0x7   :  { %p937_p2 = pnand %p935_p1, %p932_p0 }
   0x9   :  { %940 = shalt.err (!%p937_p2)
}
   0xa   :  { %s941_s14 = scalar_lea.vmem %s39_s28, 2048  ;;  %p946_p4 = scmp.lt.s32.totalorder %s39_s28, %s39_s28 }
   0xb   :  { %p942_p3 = scmp.ne.s32.totalorder %s39_s28, %s941_s14  ;;  %p947_p5 = scmp.lt.s32.totalorder %s941_s14, %s941_s14 }
   0xd   :  { %p948_p6 = por %p947_p5, %p946_p4 }
   0xf   :  { %p949_p7 = pnand %p948_p6, %p942_p3 }
  0x11   :  { %952 = shalt.err (!%p949_p7)
}
  0x12   :  { %s1050_s15 = smov 64   ;;  %s1051_s16 = smov 4  }
  0x13   :  { %44 = dma.hbm_to_vmem [thread:$0]  %s1220_s3, 2048, %s39_s28, [#allocation6], %s1050_s15, %s1050_s15, %s1051_s16  }
  0x14   :  { %s1052_s19 = smov [#allocation2]   ;;  %s953_s23 = scalar_lea.hbm %s1218_s1, 512 }
  0x15   :  { %s24_s20 = sshll.u32 %s1052_s19, 4  ;;  %p954_p8 = scmp.ne.s32.totalorder %s1218_s1, %s953_s23  ;;  %s25_s20 = int_to_ptr.vmem [resolvable:$true] %s24_s20 }
  0x16   :  { %p957_p9 = scmp.lt.u32.totalorder %s953_s23, %s1218_s1 }
  0x18   :  { %p959_p10 = pnand %p957_p9, %p954_p8 }
  0x1a   :  { %962 = shalt.err (!%p959_p10)
}
  0x1b   :  { %s963_s29 = scalar_lea.vmem %s25_s20, 512  ;;  %p968_p12 = scmp.lt.s32.totalorder %s25_s20, %s25_s20 }
  0x1c   :  { %p964_p11 = scmp.ne.s32.totalorder %s25_s20, %s963_s29  ;;  %p969_p13 = scmp.lt.s32.totalorder %s963_s29, %s963_s29 }
  0x1e   :  { %p970_p0 = por %p969_p13, %p968_p12 }
  0x20   :  { %p971_p1 = pnand %p970_p0, %p964_p11 }
  0x22   :  { %974 = shalt.err (!%p971_p1)
}
  0x23   :  { %s1053_s3 = smov 256   ;;  %s1054_s28 = smov 16  }
  0x24   :  { %30 = dma.hbm_to_vmem [thread:$0]  %s1218_s1, 512, %s25_s20, [#allocation3], %s1053_s3, %s1053_s3, %s1054_s28  }
  0x25   :  { %s1055_s10 = smov [#allocation7]   ;;  %s975_s14 = scalar_lea.hbm %s1222_s5, 2048 }
  0x26   :  { %s52_s11 = sshll.u32 %s1055_s10, 4  ;;  %p976_p2 = scmp.ne.s32.totalorder %s1222_s5, %s975_s14  ;;  %s53_s11 = int_to_ptr.vmem [resolvable:$true] %s52_s11 }
  0x27   :  { %p979_p3 = scmp.lt.u32.totalorder %s975_s14, %s1222_s5 }
  0x29   :  { %p981_p4 = pnand %p979_p3, %p976_p2 }
  0x2b   :  { %984 = shalt.err (!%p981_p4)
}
  0x2c   :  { %s985_s19 = scalar_lea.vmem %s53_s11, 2048  ;;  %p990_p6 = scmp.lt.s32.totalorder %s53_s11, %s53_s11 }
  0x2d   :  { %p986_p5 = scmp.ne.s32.totalorder %s53_s11, %s985_s19  ;;  %p991_p7 = scmp.lt.s32.totalorder %s985_s19, %s985_s19 }
  0x2f   :  { %p992_p8 = por %p991_p7, %p990_p6 }
  0x31   :  { %p993_p9 = pnand %p992_p8, %p986_p5 }
  0x33   :  { %996 = shalt.err (!%p993_p9)
}
  0x34   :  { %s1056_s1 = smov 128   ;;  %s1057_s20 = smov 8  }
  0x35   :  { %58 = dma.hbm_to_vmem [thread:$0]  %s1222_s5, 2048, %s53_s11, [#allocation6], %s1056_s1, %s1056_s1, %s1057_s20  }
  0x36   :  { %s1058_s23 = smov [#allocation8]   ;;  %s997_s27 = scalar_lea.hbm %s1224_s7, 2048 }
  0x37   :  { %s66_s24 = sshll.u32 %s1058_s23, 4  ;;  %p998_p10 = scmp.ne.s32.totalorder %s1224_s7, %s997_s27  ;;  %s67_s24 = int_to_ptr.vmem [resolvable:$true] %s66_s24 }
  0x38   :  { %p1001_p11 = scmp.lt.u32.totalorder %s997_s27, %s1224_s7 }
  0x3a   :  { %p1003_p12 = pnand %p1001_p11, %p998_p10 }
  0x3c   :  { %1006 = shalt.err (!%p1003_p12)
}
  0x3d   :  { %s1007_s12 = scalar_lea.vmem %s67_s24, 2048  ;;  %p1012_p0 = scmp.lt.s32.totalorder %s67_s24, %s67_s24 }
  0x3e   :  { %p1008_p13 = scmp.ne.s32.totalorder %s67_s24, %s1007_s12  ;;  %p1013_p1 = scmp.lt.s32.totalorder %s1007_s12, %s1007_s12 }
  0x40   :  { %p1014_p2 = por %p1013_p1, %p1012_p0 }
  0x42   :  { %p1015_p3 = pnand %p1014_p2, %p1008_p13 }
  0x44   :  { %1018 = shalt.err (!%p1015_p3)
}
  0x45   :  { %72 = dma.hbm_to_vmem [thread:$0]  %s1224_s7, 2048, %s67_s24, [#allocation9], %s1056_s1, %s1056_s1, %s1057_s20  }
  0x46   :  { %1041 = dma.done.wait [#allocation3], 512  }
  0x47   :  { %1042 = vsyncadd [#allocation3], 4294966784 }
  0x48   :  { %1043 = dma.done.wait [#allocation6], 4096  }
  0x49   :  { %1044 = vsyncadd [#allocation6], 4294963200 }
  0x4a   :  { %1045 = dma.done.wait [#allocation9], 2048  }
  0x4b   :  { %1046 = vsyncadd [#allocation9], 4294965248  ;;  %v1059_v0 = vmov 0   ;;  %v879_v1 = vld [vmem:[#allocation5 + $0x40] sm:$0xff]   ;;  %v881_v3 = vld [vmem:[#allocation5 + $0x48] sm:$0xff]  }
  0x4c   :  { %878 = vset.pattern.permute.xlu0 %v1059_v0  ;;  %436 = vmatprep.mubr.bf16.mxu1 %v1059_v0  ;;  %v880_v2 = vld [vmem:[#allocation5] sm:$0xff]   ;;  %v882_v4 = vld [vmem:[#allocation5 + $0x8] sm:$0xff]   ;;  %v883_v5 = vld [vmem:[#allocation5 + $0x50] sm:$0xff]  }
  0x4d   :  { %674 = vmatprep.subr.bf16.mxu0 %v879_v1  ;;  %v884_v6 = vld [vmem:[#allocation5 + $0x10] sm:$0xff]   ;;  %v885_v7 = vld [vmem:[#allocation5 + $0x58] sm:$0xff]   ;;  %v887_v9 = vld [vmem:[#allocation5 + $0x60] sm:$0xff]  }
  0x4e   :  { %675 = vmatpush3.bf16.msra.mxu0 %v880_v2  ;;  %v886_v8 = vld [vmem:[#allocation5 + $0x18] sm:$0xff]   ;;  %v888_v10 = vld [vmem:[#allocation5 + $0x20] sm:$0xff]   ;;  %v889_v11 = vld [vmem:[#allocation5 + $0x68] sm:$0xff]  }
  0x4f   :  { %676 = vmatprep.subr.bf16.mxu0 %v881_v3  ;;  %v1157_v12 = vld [vmem:[#allocation2 + $0x8] sm:$0xff]  ;;  %v1159_v13 = vld [vmem:[#allocation2 + $0x18] sm:$0xff]  ;;  %v86_v16 = vld [vmem:[%s1217_s0] sm:$0xff] }
  0x50   :  { %v890_v14 = vld [vmem:[#allocation5 + $0x28] sm:$0xff]   ;;  %v93_v15 = vpack.c.bf16 %v1159_v13, %v1157_v12  ;;  %97 = vperm.xlu0 %878, %v86_v16   ;;  %v891_v20 = vld [vmem:[#allocation5 + $0x70] sm:$0xff]   ;;  %v893_v24 = vld [vmem:[#allocation5 + $0x78] sm:$0xff]  }
  0x51   :  { %v87_v17 = vld [vmem:[%s1217_s0 + $0x8] sm:$0xff]  ;;  %v898_v21 = vld [vmem:[#allocation7 + $0x14] ss:$8 sps:$4 sm:$0xff]   ;;  %v900_v23 = vld [vmem:[#allocation7 + $0x10] ss:$8 sps:$4 sm:$0xff]  }
  0x52   :  { %677 = vmatpush3.bf16.msra.mxu0 %v882_v4  ;;  %v895_v18 = vld [vmem:[#allocation7 + $0x4] ss:$8 sps:$4 sm:$0xff]   ;;  %273 = vmatprep.mubr.bf16.mxu0 %v93_v15  ;;  %v897_v19 = vld [vmem:[#allocation7] ss:$8 sps:$4 sm:$0xff]   ;;  %v892_v22 = vld [vmem:[#allocation5 + $0x30] sm:$0xff]  }
  0x53   :  { %678 = vmatprep.subr.bf16.mxu0 %v883_v5  ;;  %404 = vmatprep.subr.bf16.mxu1 %v895_v18  ;;  %v901_v25 = vld [vmem:[#allocation7 + $0x24] ss:$8 sps:$4 sm:$0xff]   ;;  %v903_v26 = vld [vmem:[#allocation7 + $0x20] ss:$8 sps:$4 sm:$0xff]   ;;  %v894_v27 = vld [vmem:[#allocation5 + $0x38] sm:$0xff]  }
  0x54   :  { %405 = vmatpush1.bf16.msra.mxu1 %v897_v19  ;;  %102 = vperm.xlu0 %878, %v87_v17   ;;  %v88_v28 = vld [vmem:[#allocation2] sm:$0xff]  ;;  %v1169_v29 = vld [vmem:[#allocation2 + $0x10] sm:$0xff]  ;;  %v452_v33 = vld [vmem:[#allocation8 + $0x8] sm:$0xff] }
  0x55   :  { %406 = vmatprep.subr.bf16.mxu1 %v898_v21  ;;  %v92_v30 = vpack.c.bf16 %v1169_v29, %v88_v28  ;;  %v904_v31 = vld [vmem:[#allocation7 + $0x34] ss:$8 sps:$4 sm:$0xff]   ;;  %v451_v32 = vld [vmem:[#allocation8] sm:$0xff]  ;;  %v906_v34 = vld [vmem:[#allocation7 + $0x30] ss:$8 sps:$4 sm:$0xff]  }
  0x56   :  { %679 = vmatpush3.bf16.msra.mxu0 %v884_v6  ;;  %v1172_v35 = vpack.c.bf16 %v452_v33, %v451_v32  ;;  %v907_v36 = vld [vmem:[#allocation7 + $0x44] ss:$8 sps:$4 sm:$0xff]   ;;  %v453_v37 = vld [vmem:[#allocation8 + $0x10] sm:$0xff]  ;;  %v909_v38 = vld [vmem:[#allocation7 + $0x40] ss:$8 sps:$4 sm:$0xff]  }
  0x57   :  { %680 = vmatprep.subr.bf16.mxu0 %v885_v7  ;;  %v454_v39 = vld [vmem:[#allocation8 + $0x18] sm:$0xff]  ;;  %v455_v42 = vld [vmem:[#allocation8 + $0x20] sm:$0xff]  ;;  %v456_v43 = vld [vmem:[#allocation8 + $0x28] sm:$0xff] }
  0x58   :  { %407 = vmatpush1.bf16.msra.mxu1 %v900_v23  ;;  %v1176_v40 = vpack.c.bf16 %v454_v39, %v453_v37  ;;  %v910_v41 = vld [vmem:[#allocation7 + $0x54] ss:$8 sps:$4 sm:$0xff]   ;;  %v912_v44 = vld [vmem:[#allocation7 + $0x50] ss:$8 sps:$4 sm:$0xff]   ;;  %v1180_v45 = vpack.c.bf16 %v456_v43, %v455_v42  ;;  %v913_v46 = vld [vmem:[#allocation7 + $0x64] ss:$8 sps:$4 sm:$0xff]   ;;  %v314_v23 = vlaneseq }
  0x59   :  { %408 = vmatprep.subr.bf16.mxu1 %v901_v25  ;;  %v457_v47 = vld [vmem:[#allocation8 + $0x30] sm:$0xff]  ;;  %v915_v48 = vld [vmem:[#allocation7 + $0x60] ss:$8 sps:$4 sm:$0xff]   ;;  %v458_v49 = vld [vmem:[#allocation8 + $0x38] sm:$0xff] }
  0x5a   :  { %681 = vmatpush3.bf16.msra.mxu0 %v886_v8  ;;  %v814_v50 = vpack.c.bf16 %v458_v49, %v457_v47  ;;  %v916_v51 = vld [vmem:[#allocation7 + $0x74] ss:$8 sps:$4 sm:$0xff]   ;;  %v459_v52 = vld [vmem:[#allocation8 + $0x40] sm:$0xff]  ;;  %v460_v53 = vld [vmem:[#allocation8 + $0x48] sm:$0xff] }
  0x5b   :  { %682 = vmatprep.subr.bf16.mxu0 %v887_v9  ;;  %v818_v54 = vpack.c.bf16 %v460_v53, %v459_v52  ;;  %v918_v55 = vld [vmem:[#allocation7 + $0x70] ss:$8 sps:$4 sm:$0xff]   ;;  %v463_v59 = vld [vmem:[#allocation8 + $0x60] sm:$0xff]  ;;  %v464_v60 = vld [vmem:[#allocation8 + $0x68] sm:$0xff] }
  0x5c   :  { %409 = vmatpush1.bf16.msra.mxu1 %v903_v26  ;;  %v461_v56 = vld [vmem:[#allocation8 + $0x50] sm:$0xff]  ;;  %v462_v57 = vld [vmem:[#allocation8 + $0x58] sm:$0xff]  ;;  %v826_v61 = vpack.c.bf16 %v464_v60, %v463_v59  ;;  %v640_v2 = vld [vmem:[%s1219_s2] ss:$0 sm:$0xff] }
  0x5d   :  { %410 = vmatprep.subr.bf16.mxu1 %v904_v31  ;;  %v822_v58 = vpack.c.bf16 %v462_v57, %v461_v56  ;;  %v465_v62 = vld [vmem:[#allocation8 + $0x70] sm:$0xff]  ;;  %v466_v63 = vld [vmem:[#allocation8 + $0x78] sm:$0xff]  ;;  %v657_v9 = vld [vmem:[%s1221_s4] ss:$0 sm:$0xff] }
  0x5e   :  { %683 = vmatpush3.bf16.msra.mxu0 %v888_v10  ;;  %v830_v0 = vpack.c.bf16 %v466_v63, %v465_v62  ;;  %v312_v26 = vld [vmem:[%s1223_s6] sm:$0x3]  ;;  %s1060_s6 = smov [#allocation10]  }
  0x5f   :  { %684 = vmatprep.subr.bf16.mxu0 %v889_v11  ;;  %s626_s19 = sshll.u32 %s1060_s6, 4  ;;  %s627_s19 = int_to_ptr.vmem [resolvable:$true] %s626_s19 }
  0x60   :  { %411 = vmatpush1.bf16.msra.mxu1 %v906_v34  ;;  %s1019_s1 = scalar_lea.vmem %s627_s19, 512  ;;  %p1024_p5 = scmp.lt.s32.totalorder %s627_s19, %s627_s19 }
  0x61   :  { %412 = vmatprep.subr.bf16.mxu1 %v907_v36  ;;  %p1020_p4 = scmp.ne.s32.totalorder %s627_s19, %s1019_s1  ;;  %p1025_p6 = scmp.lt.s32.totalorder %s1019_s1, %s1019_s1 }
  0x62   :  { %685 = vmatpush3.bf16.msra.mxu0 %v890_v14 }
  0x63   :  { %686 = vmatprep.subr.bf16.mxu0 %v891_v20  ;;  %p1026_p7 = por %p1025_p6, %p1024_p5 }
  0x64   :  { %413 = vmatpush1.bf16.msra.mxu1 %v909_v38 }
  0x65   :  { %414 = vmatprep.subr.bf16.mxu1 %v910_v41  ;;  %p1027_p8 = pnand %p1026_p7, %p1020_p4 }
  0x66   :  { %687 = vmatpush3.bf16.msra.mxu0 %v892_v22 }
  0x67   :  { %688 = vmatprep.subr.bf16.mxu0 %v893_v24  ;;  %v315_v24 = vshrl.u32 %v314_v23, 7 }
  0x68   :  { %415 = vmatpush1.bf16.msra.mxu1 %v912_v44 }
  0x69   :  { %416 = vmatprep.subr.bf16.mxu1 %v913_v46  ;;  %v316_v25 = vsub.s32 0, %v315_v24  ;;  %v320_v34 = vsub.s32 1, %v315_v24 }
  0x6a   :  { %689 = vmatpush3.bf16.msra.mxu0 %v894_v27 }
  0x6b   :  { %803 = vmatprep.subr.bf16.mxu0 %v1172_v35  ;;  %v317_v27 = vrot.slane %v312_v26, %v316_v25  ;;  %v321_v37 = vrot.slane %v312_v26, %v320_v34 }
  0x6c   :  { %417 = vmatpush1.bf16.msra.mxu1 %v915_v48 }
  0x6d   :  { %274 = vmatmul.mubr.bf16.vlgmr.msra.gmra.mrb[0].mxu0 %v92_v30  ;;  %418 = vmatprep.subr.bf16.mxu1 %v916_v51 }
  0x6e   :  { %764 = vmatprep.mubr.f32.mxu0 %v88_v28  ;;  %805 = vmatpush3.bf16.msra.mxu0 %v1172_v35 }
  0x6f   :  { %807 = vmatprep.subr.bf16.mxu0 %v1176_v40 }
  0x70   :  { %419 = vmatpush1.bf16.msra.mxu1 %v918_v55 }
  0x71   :  { %835 = vmatprep.subr.bf16.mxu1 %v1172_v35 }
  0x72   :  { %809 = vmatpush3.bf16.msra.mxu0 %v1176_v40 }
  0x73   :  { %811 = vmatprep.subr.bf16.mxu0 %v1180_v45 }
  0x76   :  { %813 = vmatpush3.bf16.msra.mxu0 %v1180_v45 }
  0x77   :  { %815 = vmatprep.subr.bf16.mxu0 %v814_v50 }
  0x7a   :  { %817 = vmatpush3.bf16.msra.mxu0 %v814_v50 }
  0x7b   :  { %819 = vmatprep.subr.bf16.mxu0 %v818_v54 }
  0x7e   :  { %821 = vmatpush3.bf16.msra.mxu0 %v818_v54 }
  0x7f   :  { %823 = vmatprep.subr.bf16.mxu0 %v822_v58 }
  0x82   :  { %825 = vmatpush3.bf16.msra.mxu0 %v822_v58 }
  0x83   :  { %827 = vmatprep.subr.bf16.mxu0 %v826_v61 }
  0x86   :  { %829 = vmatpush3.bf16.msra.mxu0 %v826_v61 }
  0x87   :  { %831 = vmatprep.subr.bf16.mxu0 %v830_v0 }
  0x8a   :  { %833 = vmatpush3.bf16.msra.mxu0 %v830_v0 }
  0x8d   :  { %765 = vmatmul.mubr.f32.vlgmr.msra.gmra.mrb[4].mxu0 %v1169_v29 }
  0xcf   :  { %v98_v1 = vpop.permute.xlu0 %97 }
  0xd0   :  { %v111_v6 = vmul.f32 %v640_v2, %v98_v1 }
  0xd3   :  { %v103_v4 = vpop.permute.xlu0 %102 }
  0xd4   :  { %v112_v11 = vmul.f32 %v640_v2, %v103_v4 }
 0x140   :  { %v690_v3 = vpop.f32.mrb[0].mxu0 }
 0x141   :  { %v691_v5 = vpop.f32.mrb[1].mxu0 }
 0x142   :  { %v692_v7 = vadd.f32 %v691_v5, %v690_v3  ;;  %v693_v8 = vpop.f32.mrb[2].mxu0 }
 0x143   :  { %v694_v10 = vpop.f32.mrb[3].mxu0 }
 0x144   :  { %v282_v14 = vadd.f32 %v692_v7, %v111_v6  ;;  %v695_v15 = vadd.f32 %v694_v10, %v693_v8 }
 0x146   :  { %v291_v16 = vadd.f32 %v657_v9, %v282_v14  ;;  %v283_v17 = vadd.f32 %v695_v15, %v112_v11 }
 0x148   :  { %v292_v18 = vadd.f32 %v657_v9, %v283_v17  ;;  %919 = vtanh.f32 %v291_v16 }
 0x14a   :  { %921 = vtanh.f32 %v292_v18 }
 0x152   :  { %v920_v19 = vpop.eup %919 }
 0x154   :  { %v922_v20 = vpop.eup %921 }
 0x155   :  { %v295_v21 = vpack.c.bf16 %v922_v20, %v920_v19 }
 0x157   :  { %437 = vmatmul.mubr.bf16.vlgmr.msra.gmra.mrb[0].mxu1 %v295_v21 }
 0x158   :  { %837 = vmatpush3.bf16.msra.mxu1 %v1172_v35  ;;  %799 = vmatprep.mubr.f32.mxu1 %v1157_v12 }
 0x159   :  { %839 = vmatprep.subr.bf16.mxu1 %v1176_v40 }
 0x15c   :  { %841 = vmatpush3.bf16.msra.mxu1 %v1176_v40 }
 0x15d   :  { %843 = vmatprep.subr.bf16.mxu1 %v1180_v45 }
 0x160   :  { %845 = vmatpush3.bf16.msra.mxu1 %v1180_v45  ;;  %v766_v12 = vpop.f32.mrb[4].mxu0 }
 0x161   :  { %847 = vmatprep.subr.bf16.mxu1 %v814_v50  ;;  %v533_v22 = vpop.f32.mrb[5].mxu0 }
 0x164   :  { %849 = vmatpush3.bf16.msra.mxu1 %v814_v50 }
 0x165   :  { %851 = vmatprep.subr.bf16.mxu1 %v818_v54 }
 0x168   :  { %853 = vmatpush3.bf16.msra.mxu1 %v818_v54 }
 0x169   :  { %855 = vmatprep.subr.bf16.mxu1 %v822_v58 }
 0x16c   :  { %857 = vmatpush3.bf16.msra.mxu1 %v822_v58 }
 0x16d   :  { %859 = vmatprep.subr.bf16.mxu1 %v826_v61 }
 0x170   :  { %861 = vmatpush3.bf16.msra.mxu1 %v826_v61 }
 0x171   :  { %863 = vmatprep.subr.bf16.mxu1 %v830_v0 }
 0x174   :  { %865 = vmatpush3.bf16.msra.mxu1 %v830_v0 }
 0x177   :  { %800 = vmatmul.mubr.f32.vlgmr.msra.gmra.mrb[4].mxu1 %v1159_v13 }
 0x22a   :  { %v438_v28 = vpop.f32.mrb[0].mxu1 }
 0x22b   :  { %v439_v29 = vadd.f32 %v438_v28, %v317_v27  ;;  %v440_v30 = vpop.f32.mrb[1].mxu1 }
 0x22c   :  { %v442_v31 = vpop.f32.mrb[2].mxu1  ;;  %v441_v40 = vadd.f32 %v440_v30, %v321_v37 }
 0x22d   :  { %923 = vtanh.f32 %v439_v29  ;;  %v443_v32 = vadd.f32 %v442_v31, %v317_v27  ;;  %v444_v33 = vpop.f32.mrb[3].mxu1 }
 0x22e   :  { %v445_v39 = vadd.f32 %v444_v33, %v321_v37 }
 0x22f   :  { %925 = vtanh.f32 %v443_v32 }
 0x230   :  { %927 = vtanh.f32 %v445_v39 }
 0x231   :  { %929 = vtanh.f32 %v441_v40 }
 0x237   :  { %v924_v13 = vpop.eup %923 }
 0x238   :  { %v534_v35 = vadd.f32 %v924_v13, %v533_v22 }
 0x239   :  { %v926_v36 = vpop.eup %925 }
 0x23a   :  { %v539_v38 = vadd.f32 %v926_v36, %v766_v12  ;;  %542 = vst [vmem:[#allocation10] sm:$0xff] %v534_v35  ;;  %v928_v41 = vpop.eup %927 }
 0x23b   :  { %v930_v43 = vpop.eup %929 }
 0x23c   :  { %543 = vst [vmem:[#allocation10 + $0x10] sm:$0xff] %v539_v38 }
 0x24a   :  { %v801_v42 = vpop.f32.mrb[4].mxu1 }
 0x24b   :  { %v616_v44 = vadd.f32 %v928_v41, %v801_v42  ;;  %v610_v45 = vpop.f32.mrb[5].mxu1 }
 0x24c   :  { %v611_v46 = vadd.f32 %v930_v43, %v610_v45 }
 0x24d   :  { %620 = vst [vmem:[#allocation10 + $0x18] sm:$0xff] %v616_v44 }
 0x24e   :  { %619 = vst [vmem:[#allocation10 + $0x8] sm:$0xff] %v611_v46 }
 0x24f   :  { %1030 = shalt.err (!%p1027_p8)
}
 0x250   :  { %s1031_s22 = scalar_lea.hbm %s1225_s8, 512 }
 0x251   :  { %p1032_p9 = scmp.ne.s32.totalorder %s1225_s8, %s1031_s22  ;;  %p1035_p10 = scmp.lt.u32.totalorder %s1031_s22, %s1225_s8 }
 0x253   :  { %p1037_p11 = pnand %p1035_p10, %p1032_p9 }
 0x255   :  { %1040 = shalt.err (!%p1037_p11)
}
 0x256   :  { %632 = dma.vmem_to_hbm [thread:$0]  %s627_s19, 512, %s1225_s8, [#allocation4], %s1053_s3, %s1053_s3, %s1054_s28  }
 0x257   :  { %1047 = dma.done.wait [#allocation4], 512  }
 0x258   :  { %1048 = vsyncadd [#allocation4], 4294966784 }
 0x259   :  { %636 = vsyncpa [#allocation3], 1 }
 0x25a   :  { %637 = vsyncpa [#allocation6], 1 }
 0x25b   :  { %638 = vsyncpa [#allocation9], 1 }
 0x25c   :  { %639 = vsyncpa [#allocation4], 1 }

</bundles_post_ra>
